<compile_context>
chip_gen: v6e
topology: v6e:2x2x1
jax: 0.10.0
libtpu: 0.0.40
codegen_flags: <defaults>
</compile_context>

<pallas_src>
import jax
import jax.numpy as jnp
from jax.experimental import pallas as pl
from jax.experimental.pallas import tpu as pltpu


# ----------------------------------------------------------------------------- helpers
def _vmem_capacity_bytes():
    """Per-core VMEM capacity; conservative 64 MiB fallback (v7x) if the query fails."""
    try:
        return int(pltpu.get_tpu_info().vmem_capacity_bytes)
    except Exception:
        return 64 << 20


# ----------------------------------------------------------------------------- kernels
def _make_tiled_kernel(true_b):
    """Fallback kernel over one (TB, A, C) batch tile; emits a lane-dense partial sum."""

    def kernel(outputs_ref, angle_ref, labels_ref, partial_ref):
        t = pl.program_id(0)
        tb, a_bins, n_cls = outputs_ref.shape
        ang = angle_ref[...]                              # (TB, 1) int32, in [0, A)
        lab = labels_ref[...]                             # (TB, 1) int32

        # Angle select as a small static loop of 2-D select+adds: no (TB, A, C) f32
        # temp, no sublane reduce.  A is small whenever this fallback path is chosen.
        sel = jnp.zeros((tb, n_cls), jnp.float32)
        for a in range(a_bins):
            sel = sel + jnp.where(ang == a,
                                  outputs_ref[:, a, :].astype(jnp.float32), 0.0)

        # Cross-entropy with integer targets (mean reduction done in the wrapper).
        m = jnp.max(sel, axis=-1, keepdims=True)
        lse = m + jnp.log(jnp.sum(jnp.exp(sel - m), axis=-1, keepdims=True))
        c_iota = jax.lax.broadcasted_iota(jnp.int32, (tb, n_cls), 1)
        picked = jnp.sum(jnp.where(c_iota == lab, sel, 0.0),
                         axis=-1, keepdims=True)

        # Mask rows past the true batch size (last, possibly partial, tile).
        row = jax.lax.broadcasted_iota(jnp.int32, (tb, 1), 0) + t * tb
        contrib = jnp.where(row < true_b, lse - picked, 0.0)

        # Lane-dense partial output: one 128-wide f32 row per tile (unmasked vst).
        partial_ref[...] = jnp.broadcast_to(
            jnp.sum(contrib), partial_ref.shape).astype(jnp.float32)

    return kernel


def _make_gather_kernel(true_b, a_bins, tb):
    """Batched row-gather kernel: TB manual DMAs HBM->VMEM, then CE on the (TB, C) tile."""

    def kernel(angle_sref, labels_ref, rows_hbm, partial_ref, buf, sem):
        t = pl.program_id(0)
        base = t * tb

        # Issue TB independent (1, C) row gathers: rows_hbm[b*A + angle[b]] -> buf[i].
        # Padded tail rows (b >= true_b) are clamped to a valid row and masked later,
        # so every DMA stays in bounds.
        @pl.loop(0, tb)
        def _issue(i):
            b = jnp.minimum(base + i, true_b - 1)
            src = b * a_bins + angle_sref[b]          # angle pre-clipped to [0, A)
            pltpu.make_async_copy(rows_hbm.at[pl.ds(src, 1)],
                                  buf.at[pl.ds(i, 1)],
                                  sem.at[0]).start()

        # Wait for all TB copies.  All copies signal the same semaphore with the same
        # byte count, and compute only starts after every wait, so ordering is safe.
        @pl.loop(0, tb)
        def _wait(i):
            pltpu.make_async_copy(rows_hbm.at[pl.ds(0, 1)],
                                  buf.at[pl.ds(i, 1)],
                                  sem.at[0]).wait()

        rows = buf[...].astype(jnp.float32)           # (TB, C)
        m = jnp.max(rows, axis=-1, keepdims=True)
        lse = m + jnp.log(jnp.sum(jnp.exp(rows - m), axis=-1, keepdims=True))
        lab = labels_ref[...]                         # (TB, 1) int32
        c_iota = jax.lax.broadcasted_iota(jnp.int32, rows.shape, 1)
        picked = jnp.sum(jnp.where(c_iota == lab, rows, 0.0),
                         axis=-1, keepdims=True)

        rid = jax.lax.broadcasted_iota(jnp.int32, (tb, 1), 0) + base
        contrib = jnp.where(rid < true_b, lse - picked, 0.0)

        # Lane-dense, per-tile partial -> independent output blocks -> "parallel" grid.
        partial_ref[...] = jnp.broadcast_to(
            jnp.sum(contrib), partial_ref.shape).astype(jnp.float32)

    return kernel


# ----------------------------------------------------------------------------- wrappers
def _pick_block_b_tiled(B, A, C, itemsize, cap):
    """Batch tile for the streaming path: ~cap/4 for the double-buffered input tile
    (≈32 MiB on v5e/v6e, ≈16 MiB on v7x)."""
    budget = min(cap // 4, 48 << 20)
    per_row = 2 * A * C * itemsize + 4 * C        # 2x: double buffering; + f32 accum row
    tb = max(8, budget // max(per_row, 1))
    tb = min(int(tb), 512)
    if tb >= B:
        return B                                  # single full-extent tile is always legal
    return (tb // 8) * 8                          # keep (8, ...) tiling alignment


def _pick_block_b_gather(B, C, itemsize, cap):
    """Batch tile for the gather path: (TB, C) scratch stays well under VMEM."""
    budget = min(cap // 8, 8 << 20)
    tb = budget // max(C * itemsize, 1)
    tb = int(min(tb, 256))
    if tb >= B:
        return B
    return max(8, (tb // 8) * 8)


def _custom_loss_tiled(outputs, labels, angle, block_b=None):
    B, A, C = outputs.shape
    itemsize = outputs.dtype.itemsize
    cap = _vmem_capacity_bytes()
    if block_b is None:
        tb = _pick_block_b_tiled(B, A, C, itemsize, cap)
    else:
        tb = min(int(block_b), B)
        if tb < B:
            tb = max(8, (tb // 8) * 8)
    n_tiles = pl.cdiv(B, tb)

    angle2d = angle.reshape(B, 1)
    labels2d = labels.reshape(B, 1)

    # Double-buffered input tiles + f32 select/LSE temps + indices + partials + slack,
    # clamped to 3/4 of the chip's physical VMEM (v7x safe).
    needed = (2 * tb * A * C * itemsize + 3 * tb * C * 4
              + 2 * 2 * tb * 4 + 2 * 128 * 4)
    vmem_limit = int(min(max(needed + (4 << 20), 16 << 20), (cap * 3) // 4))

    partials = pl.pallas_call(
        _make_tiled_kernel(B),
        out_shape=jax.ShapeDtypeStruct((n_tiles, 1, 128), jnp.float32),
        grid_spec=pltpu.PrefetchScalarGridSpec(
            num_scalar_prefetch=0,
            grid=(n_tiles,),
            in_specs=[
                pl.BlockSpec((tb, A, C), lambda t: (t, 0, 0)),
                pl.BlockSpec((tb, 1), lambda t: (t, 0)),
                pl.BlockSpec((tb, 1), lambda t: (t, 0)),
            ],
            out_specs=pl.BlockSpec((1, 1, 128), lambda t: (t, 0, 0)),
        ),
        compiler_params=pltpu.CompilerParams(
            dimension_semantics=("parallel",),
            vmem_limit_bytes=vmem_limit,
        ),
    )(outputs, angle2d, labels2d)

    return jnp.sum(partials[:, 0, 0]) / B


def _custom_loss_gather(outputs, labels, angle, block_b=None):
    B, A, C = outputs.shape
    itemsize = outputs.dtype.itemsize
    cap = _vmem_capacity_bytes()
    if block_b is None:
        tb = _pick_block_b_gather(B, C, itemsize, cap)
    else:
        tb = min(int(block_b), B)
        if tb < B:
            tb = max(8, (tb // 8) * 8)
    n_tiles = pl.cdiv(B, tb)

    rows = outputs.reshape(B * A, C)              # contiguous -> free reshape
    labels2d = labels.reshape(B, 1)

    needed = (tb * C * itemsize                    # gather scratch
              + 3 * tb * C * 4                     # f32 intermediates headroom
              + 2 * tb * 4 + 2 * 128 * 4)          # labels + partial (double-buffered)
    vmem_limit = int(min(max(needed + (4 << 20), 16 << 20), (cap * 3) // 4))

    partials = pl.pallas_call(
        _make_gather_kernel(B, A, tb),
        out_shape=jax.ShapeDtypeStruct((n_tiles, 1, 128), jnp.float32),
        grid_spec=pltpu.PrefetchScalarGridSpec(
            num_scalar_prefetch=1,                 # angle lives in SMEM
            grid=(n_tiles,),
            in_specs=[
                pl.BlockSpec((tb, 1), lambda t, ang: (t, 0)),   # labels -> VMEM tile
                pl.BlockSpec(memory_space=pl.ANY),              # outputs rows stay in HBM
            ],
            out_specs=pl.BlockSpec((1, 1, 128), lambda t, ang: (t, 0, 0)),
            scratch_shapes=[
                pltpu.VMEM((tb, C), outputs.dtype),
                pltpu.SemaphoreType.DMA((1,)),
            ],
        ),
        compiler_params=pltpu.CompilerParams(
            dimension_semantics=("parallel",),
            vmem_limit_bytes=vmem_limit,
        ),
    )(angle, labels2d, rows)

    return jnp.sum(partials[:, 0, 0]) / B


def custom_loss(outputs, labels, angle, *, block_b=None, use_dma_gather=None):
    """Pallas TPU CustomLoss.forward.

    outputs: (B, A, C) float logits; labels: (B,) ints in [0, C); angle: (B,) ints in [0, A).
    Returns the scalar mean cross-entropy of outputs[arange(B), angle, :] vs labels.
    """
    B, A, C = outputs.shape
    # angle.long() equivalent; clip so both paths agree and DMAs stay in bounds
    # (PyTorch would raise on out-of-range angle — we clamp instead).
    angle = jnp.clip(angle.astype(jnp.int32), 0, A - 1)
    labels = labels.astype(jnp.int32)
    if use_dma_gather is None:
        # The batched gather moves only 1/A of the bytes and amortizes its per-step
        # cost over TB rows, so use it whenever there is anything to skip and the
        # per-sample slab isn't trivially small.
        use_dma_gather = (A >= 2) and (A * C * outputs.dtype.itemsize >= 4096)
    if use_dma_gather:
        return _custom_loss_gather(outputs, labels, angle, block_b=block_b)
    return _custom_loss_tiled(outputs, labels, angle, block_b=block_b)


def custom_loss_ref(outputs, labels, angle):
    """Plain-JAX reference mirroring the PyTorch module."""
    B = outputs.shape[0]
    sel = outputs[jnp.arange(B), angle, :].astype(jnp.float32)
    logp = jax.nn.log_softmax(sel, axis=-1)
    return -jnp.mean(logp[jnp.arange(B), labels])


# ----------------------------------------------------------------------------- test
if __name__ == "__main__":
    base = jax.random.PRNGKey(0)

    def make_inputs(tag, B, A, C):
        k1, k2, k3 = jax.random.split(jax.random.fold_in(base, tag), 3)
        outputs = jax.random.normal(k1, (B, A, C), dtype=jnp.float32)
        labels = jax.random.randint(k2, (B,), 0, C, dtype=jnp.int32)
        angle = jax.random.randint(k3, (B,), 0, A, dtype=jnp.int32)
        return outputs, labels, angle

    # 1) Small shapes, tiled fallback path (single full-extent tile).
    o, l, a = make_inputs(0, 8, 4, 32)
    got = jax.block_until_ready(custom_loss(o, l, a))
    ref = custom_loss_ref(o, l, a)
    assert jnp.allclose(got, ref, atol=1e-5, rtol=1e-5), (got, ref)

    # 2) Tiled path, batch not divisible by the block: multi-tile grid + row masking.
    o, l, a = make_inputs(1, 13, 4, 32)
    got = jax.block_until_ready(custom_loss(o, l, a, block_b=8, use_dma_gather=False))
    ref = custom_loss_ref(o, l, a)
    assert jnp.allclose(got, ref, atol=1e-5, rtol=1e-5), (got, ref)

    # 3) Batched DMA-gather path (default heuristic picks it for this shape too).
    o, l, a = make_inputs(2, 8, 4, 256)
    got = jax.block_until_ready(custom_loss(o, l, a, use_dma_gather=True))
    ref = custom_loss_ref(o, l, a)
    assert jnp.allclose(got, ref, atol=1e-5, rtol=1e-5), (got, ref)

    # 4) Gather path with a partial last tile (multi-tile grid + clamped tail DMAs).
    o, l, a = make_inputs(3, 13, 4, 256)
    got = jax.block_until_ready(custom_loss(o, l, a, block_b=8, use_dma_gather=True))
    ref = custom_loss_ref(o, l, a)
    assert jnp.allclose(got, ref, atol=1e-5, rtol=1e-5), (got, ref)

    print("KERNEL_OK")
</pallas_src>

<mosaic_0001>
module attributes {stable_mosaic.version = 11 : i64} {
  func.func @kernel(%arg0: i32, %arg1: memref<8x4x32xf32, #tpu.memory_space<vmem>>, %arg2: memref<8x1xi32, #tpu.memory_space<vmem>>, %arg3: memref<8x1xi32, #tpu.memory_space<vmem>>, %arg4: memref<1x1x128xf32, #tpu.memory_space<vmem>>) attributes {dimension_semantics = [#tpu.dimension_semantics<parallel>], iteration_bounds = array<i64: 1>, scalar_prefetch = 0 : i64, scratch_operands = 0 : i64, tpu.core_type = #tpu.core_type<tc>, window_params = [{transform_indices = @transform_0, window_bounds = array<i64: 8, 4, 32>}, {transform_indices = @transform_1, window_bounds = array<i64: 8, 1>}, {transform_indices = @transform_2, window_bounds = array<i64: 8, 1>}, {transform_indices = @transform_3, window_bounds = array<i64: 1, 1, 128>}]} {
    %c0 = arith.constant 0 : index
    %c0_0 = arith.constant 0 : index
    %0 = vector.load %arg2[%c0, %c0_0] : memref<8x1xi32, #tpu.memory_space<vmem>>, vector<8x1xi32>
    %c0_1 = arith.constant 0 : index
    %c0_2 = arith.constant 0 : index
    %1 = vector.load %arg3[%c0_1, %c0_2] : memref<8x1xi32, #tpu.memory_space<vmem>>, vector<8x1xi32>
    %cst = arith.constant 0.000000e+00 : f32
    %2 = vector.broadcast %cst : f32 to vector<8x32xf32>
    %c0_i32 = arith.constant 0 : i32
    %3 = vector.broadcast %c0_i32 : i32 to vector<8x1xi32>
    %4 = arith.cmpi eq, %0, %3 : vector<8x1xi32>
    %c0_3 = arith.constant 0 : index
    %c0_4 = arith.constant 0 : index
    %c0_5 = arith.constant 0 : index
    %5 = vector.load %arg1[%c0_3, %c0_4, %c0_5] : memref<8x4x32xf32, #tpu.memory_space<vmem>>, vector<8x1x32xf32>
    %6 = vector.shape_cast %5 : vector<8x1x32xf32> to vector<8x32xf32>
    %cst_6 = arith.constant 0.000000e+00 : f32
    %7 = vector.shape_cast %4 : vector<8x1xi1> to vector<8x1xi1>
    %8 = vector.broadcast %7 : vector<8x1xi1> to vector<8x32xi1>
    %9 = vector.broadcast %cst_6 : f32 to vector<8x32xf32>
    %10 = arith.select %8, %6, %9 : vector<8x32xi1>, vector<8x32xf32>
    %11 = arith.addf %2, %10 : vector<8x32xf32>
    %c1_i32 = arith.constant 1 : i32
    %12 = vector.broadcast %c1_i32 : i32 to vector<8x1xi32>
    %13 = arith.cmpi eq, %0, %12 : vector<8x1xi32>
    %c0_7 = arith.constant 0 : index
    %c1 = arith.constant 1 : index
    %c0_8 = arith.constant 0 : index
    %14 = vector.load %arg1[%c0_7, %c1, %c0_8] : memref<8x4x32xf32, #tpu.memory_space<vmem>>, vector<8x1x32xf32>
    %15 = vector.shape_cast %14 : vector<8x1x32xf32> to vector<8x32xf32>
    %cst_9 = arith.constant 0.000000e+00 : f32
    %16 = vector.shape_cast %13 : vector<8x1xi1> to vector<8x1xi1>
    %17 = vector.broadcast %16 : vector<8x1xi1> to vector<8x32xi1>
    %18 = vector.broadcast %cst_9 : f32 to vector<8x32xf32>
    %19 = arith.select %17, %15, %18 : vector<8x32xi1>, vector<8x32xf32>
    %20 = arith.addf %11, %19 : vector<8x32xf32>
    %c2_i32 = arith.constant 2 : i32
    %21 = vector.broadcast %c2_i32 : i32 to vector<8x1xi32>
    %22 = arith.cmpi eq, %0, %21 : vector<8x1xi32>
    %c0_10 = arith.constant 0 : index
    %c2 = arith.constant 2 : index
    %c0_11 = arith.constant 0 : index
    %23 = vector.load %arg1[%c0_10, %c2, %c0_11] : memref<8x4x32xf32, #tpu.memory_space<vmem>>, vector<8x1x32xf32>
    %24 = vector.shape_cast %23 : vector<8x1x32xf32> to vector<8x32xf32>
    %cst_12 = arith.constant 0.000000e+00 : f32
    %25 = vector.shape_cast %22 : vector<8x1xi1> to vector<8x1xi1>
    %26 = vector.broadcast %25 : vector<8x1xi1> to vector<8x32xi1>
    %27 = vector.broadcast %cst_12 : f32 to vector<8x32xf32>
    %28 = arith.select %26, %24, %27 : vector<8x32xi1>, vector<8x32xf32>
    %29 = arith.addf %20, %28 : vector<8x32xf32>
    %c3_i32 = arith.constant 3 : i32
    %30 = vector.broadcast %c3_i32 : i32 to vector<8x1xi32>
    %31 = arith.cmpi eq, %0, %30 : vector<8x1xi32>
    %c0_13 = arith.constant 0 : index
    %c3 = arith.constant 3 : index
    %c0_14 = arith.constant 0 : index
    %32 = vector.load %arg1[%c0_13, %c3, %c0_14] : memref<8x4x32xf32, #tpu.memory_space<vmem>>, vector<8x1x32xf32>
    %33 = vector.shape_cast %32 : vector<8x1x32xf32> to vector<8x32xf32>
    %cst_15 = arith.constant 0.000000e+00 : f32
    %34 = vector.shape_cast %31 : vector<8x1xi1> to vector<8x1xi1>
    %35 = vector.broadcast %34 : vector<8x1xi1> to vector<8x32xi1>
    %36 = vector.broadcast %cst_15 : f32 to vector<8x32xf32>
    %37 = arith.select %35, %33, %36 : vector<8x32xi1>, vector<8x32xf32>
    %38 = arith.addf %29, %37 : vector<8x32xf32>
    %cst_16 = arith.constant dense<0xFF800000> : vector<8xf32>
    %39 = vector.multi_reduction <maximumf>, %38, %cst_16 [1] : vector<8x32xf32> to vector<8xf32>
    %40 = vector.shape_cast %39 : vector<8xf32> to vector<8x1xf32>
    %41 = vector.broadcast %40 : vector<8x1xf32> to vector<8x32xf32>
    %42 = arith.subf %38, %41 : vector<8x32xf32>
    %43 = math.exp %42 : vector<8x32xf32>
    %cst_17 = arith.constant dense<0.000000e+00> : vector<8xf32>
    %44 = vector.multi_reduction <add>, %43, %cst_17 [1] : vector<8x32xf32> to vector<8xf32>
    %45 = vector.shape_cast %44 : vector<8xf32> to vector<8x1xf32>
    %46 = math.log %45 : vector<8x1xf32>
    %47 = arith.addf %40, %46 : vector<8x1xf32>
    %48 = tpu.iota {dimensions = array<i32: 1>} : vector<8x32xi32>
    %49 = vector.broadcast %1 : vector<8x1xi32> to vector<8x32xi32>
    %50 = arith.cmpi eq, %48, %49 : vector<8x32xi32>
    %cst_18 = arith.constant 0.000000e+00 : f32
    %51 = vector.broadcast %cst_18 : f32 to vector<8x32xf32>
    %52 = arith.select %50, %38, %51 : vector<8x32xi1>, vector<8x32xf32>
    %cst_19 = arith.constant dense<0.000000e+00> : vector<8xf32>
    %53 = vector.multi_reduction <add>, %52, %cst_19 [1] : vector<8x32xf32> to vector<8xf32>
    %54 = vector.shape_cast %53 : vector<8xf32> to vector<8x1xf32>
    %55 = tpu.iota {dimensions = array<i32: 0>} : vector<8x1xi32>
    %c8_i32 = arith.constant 8 : i32
    %56 = arith.muli %arg0, %c8_i32 : i32
    %57 = vector.broadcast %56 : i32 to vector<8x1xi32>
    %58 = arith.addi %55, %57 : vector<8x1xi32>
    %c8_i32_20 = arith.constant 8 : i32
    %59 = vector.broadcast %c8_i32_20 : i32 to vector<8x1xi32>
    %60 = arith.cmpi slt, %58, %59 : vector<8x1xi32>
    %61 = arith.subf %47, %54 : vector<8x1xf32>
    %cst_21 = arith.constant 0.000000e+00 : f32
    %62 = vector.broadcast %cst_21 : f32 to vector<8x1xf32>
    %63 = arith.select %60, %61, %62 : vector<8x1xi1>, vector<8x1xf32>
    %64 = vector.shape_cast %63 : vector<8x1xf32> to vector<1x8x1xf32>
    %cst_22 = arith.constant dense<0.000000e+00> : vector<1xf32>
    %65 = vector.multi_reduction <add>, %64, %cst_22 [1, 2] : vector<1x8x1xf32> to vector<1xf32>
    %66 = vector.shape_cast %65 : vector<1xf32> to vector<1x1x1xf32>
    %67 = vector.extract %66[0, 0, 0] : f32 from vector<1x1x1xf32>
    %68 = vector.broadcast %67 : f32 to vector<1x1x128xf32>
    %c0_23 = arith.constant 0 : index
    %c0_24 = arith.constant 0 : index
    %c0_25 = arith.constant 0 : index
    %69 = vector.load %arg4[%c0_23, %c0_24, %c0_25] : memref<1x1x128xf32, #tpu.memory_space<vmem>>, vector<1x1x128xf32>
    tpu.vector_store %arg4[%c0_23, %c0_24, %c0_25], %68 {strides = array<i32>} : memref<1x1x128xf32, #tpu.memory_space<vmem>>, vector<1x1x128xf32>,
    return
  }
  func.func @transform_0(%arg0: i32) -> (i32, i32, i32) {
    %c0_i32 = arith.constant 0 : i32
    %c0_i32_0 = arith.constant 0 : i32
    %c0_i32_1 = arith.constant 0 : i32
    return %arg0, %c0_i32, %c0_i32_0 : i32, i32, i32
  }
  func.func @transform_1(%arg0: i32) -> (i32, i32) {
    %c0_i32 = arith.constant 0 : i32
    %c0_i32_0 = arith.constant 0 : i32
    return %arg0, %c0_i32 : i32, i32
  }
  func.func @transform_2(%arg0: i32) -> (i32, i32) {
    %c0_i32 = arith.constant 0 : i32
    %c0_i32_0 = arith.constant 0 : i32
    return %arg0, %c0_i32 : i32, i32
  }
  func.func @transform_3(%arg0: i32) -> (i32, i32, i32) {
    %c0_i32 = arith.constant 0 : i32
    %c0_i32_0 = arith.constant 0 : i32
    %c0_i32_1 = arith.constant 0 : i32
    return %arg0, %c0_i32, %c0_i32_0 : i32, i32, i32
  }
}

</mosaic_0001>

<bundles_post_ra>
// kernel: tpu_custom_call.1
= control target key start
LH: loop header
LB: loop body
LE: loop exit
PB: predicated region body
PF: predicated region fallthrough
CT: control target
= control target key end

     0   :  { %8 = vsyncpa [#allocation3], 0  ;;  %s375_s0 = inlined_call_operand.hbm [shape: f32[8,4,32], index: 0, kind: input, shape index: {}]   ;;  %s376_s1 = inlined_call_operand.vmem [shape: s32[8,1], index: 1, kind: input, shape index: {}]   ;;  %s377_s2 = inlined_call_operand.vmem [shape: s32[8,1], index: 2, kind: input, shape index: {}]   ;;  %s378_s3 = inlined_call_operand.hbm [shape: f32[1,1,128], index: 3, kind: output, shape index: {}]  }
   0x1   :  { %9 = vsyncpa [#allocation4], 0  ;;  %s310_s12 = smov [#allocation2]  }
   0x2   :  { %s15_s13 = sshll.u32 %s310_s12, 4  ;;  %s16_s13 = int_to_ptr.vmem [resolvable:$true] %s15_s13 }
   0x3   :  { %s274_s14 = scalar_lea.vmem %s16_s13, 512  ;;  %p279_p1 = scmp.lt.s32.totalorder %s16_s13, %s16_s13 }
   0x4   :  { %p275_p0 = scmp.ne.s32.totalorder %s16_s13, %s274_s14  ;;  %p280_p2 = scmp.lt.s32.totalorder %s274_s14, %s274_s14 }
   0x6   :  { %p281_p3 = por %p280_p2, %p279_p1 }
   0x8   :  { %p282_p4 = pnand %p281_p3, %p275_p0 }
   0xa   :  { %285 = shalt.err (!%p282_p4)
}
   0xb   :  { %s311_s15 = smov 64   ;;  %s312_s16 = smov 4  }
   0xc   :  { %21 = dma.hbm_to_vmem [thread:$0]  %s375_s0, 512, %s16_s13, [#allocation3], %s311_s15, %s311_s15, %s312_s16  }
   0xd   :  { %306 = dma.done.wait [#allocation3], 512  }
   0xe   :  { %307 = vsyncadd [#allocation3], 4294966784  ;;  %v313_v0 = vmov 0   ;;  %v29_v1 = vld [vmem:[%s376_s1] sm:$0xff]  ;;  %vm54_vm4 = vcmask 1041409   ;;  %vm57_vm5 = vcmask 1042434  }
   0xf   :  { %261 = vset.pattern.permute.xlu1 %v313_v0  ;;  %260 = vset.pattern.permute.xlu0 %v313_v0  ;;  %vm116_vm0 = vcmp.eq.s32.totalorder %v29_v1, 2  ;;  %vm31_vm1 = vcmp.eq.s32.totalorder %v29_v1, 0  ;;  %vm155_vm2 = vcmp.eq.s32.totalorder %v29_v1, 3  ;;  %vm77_vm3 = vcmp.eq.s32.totalorder %v29_v1, 1  ;;  %v30_v6 = vld [vmem:[%s377_s2] sm:$0xff]  ;;  %s314_s1 = smov [#allocation5]  }
  0x10   :  { %v125_v2 = vsel %vm116_vm0, 1, %v313_v0  ;;  %v40_v3 = vsel %vm31_vm1, 1, %v313_v0  ;;  %v164_v4 = vsel %vm155_vm2, 1, %v313_v0  ;;  %v86_v5 = vsel %vm77_vm3, 1, %v313_v0  ;;  %v33_v7 = vld [vmem:[#allocation2 + $0x4] sm:$0x1] }
  0x11   :  { %127 = vperm.xlu1 %261, %v125_v2   ;;  %42 = vperm.xlu0 %260, %v40_v3   ;;  %v79_v8 = vld [vmem:[#allocation2 + $0x5] sm:$0x1]  ;;  %v118_v9 = vld [vmem:[#allocation2 + $0x6] sm:$0x1]  ;;  %v34_v10 = vld [vmem:[#allocation2 + $0x8] sm:$0x1] }
  0x12   :  { %v53_v11 = vrot.slane %v33_v7, 7  ;;  %v80_v12 = vld [vmem:[#allocation2 + $0x9] sm:$0x1]  ;;  %v99_v13 = vrot.slane %v79_v8, 7  ;;  %v32_v14 = vld [vmem:[#allocation2] sm:$0x1] }
  0x13   :  { %v157_v15 = vld [vmem:[#allocation2 + $0x7] sm:$0x1]  ;;  %v78_v16 = vld [vmem:[#allocation2 + $0x1] sm:$0x1]  ;;  %v117_v17 = vld [vmem:[#allocation2 + $0x2] sm:$0x1] }
  0x14   :  { %v119_v18 = vld [vmem:[#allocation2 + $0xa] sm:$0x1]  ;;  %v138_v19 = vrot.slane %v118_v9, 7  ;;  %v35_v20 = vld [vmem:[#allocation2 + $0xc] sm:$0x1]  ;;  %v56_v21 = vrot.slane %v34_v10, 6  ;;  %v55_v24 = vsel %vm54_vm4, %v53_v11, %v32_v14  ;;  %v100_v27 = vsel %vm54_vm4, %v99_v13, %v78_v16 }
  0x15   :  { %166 = vperm.xlu1 %261, %v164_v4   ;;  %88 = vperm.xlu0 %260, %v86_v5   ;;  %v81_v22 = vld [vmem:[#allocation2 + $0xd] sm:$0x1]  ;;  %v101_v23 = vrot.slane %v80_v12, 6  ;;  %v158_v25 = vld [vmem:[#allocation2 + $0xb] sm:$0x1]  ;;  %v177_v26 = vrot.slane %v157_v15, 7 }
  0x16   :  { %v120_v28 = vld [vmem:[#allocation2 + $0xe] sm:$0x1]  ;;  %v140_v29 = vrot.slane %v119_v18, 6  ;;  %v156_v30 = vld [vmem:[#allocation2 + $0x3] sm:$0x1]  ;;  %v139_v31 = vsel %vm54_vm4, %v138_v19, %v117_v17  ;;  %v59_v33 = vrot.slane %v35_v20, 5  ;;  %v58_v36 = vsel %vm57_vm5, %v56_v21, %v55_v24 }
  0x17   :  { %v36_v32 = vld [vmem:[#allocation2 + $0x10] sm:$0x1]  ;;  %v82_v34 = vld [vmem:[#allocation2 + $0x11] sm:$0x1]  ;;  %v103_v35 = vrot.slane %v81_v22, 5  ;;  %vm60_vm6 = vcmask 1043459   ;;  %v102_v39 = vsel %vm57_vm5, %v101_v23, %v100_v27  ;;  %v178_v42 = vsel %vm54_vm4, %v177_v26, %v156_v30 }
  0x18   :  { %v159_v37 = vld [vmem:[#allocation2 + $0xf] sm:$0x1]  ;;  %v179_v38 = vrot.slane %v158_v25, 6  ;;  %v121_v40 = vld [vmem:[#allocation2 + $0x12] sm:$0x1]  ;;  %v142_v41 = vrot.slane %v120_v28, 5  ;;  %v141_v43 = vsel %vm57_vm5, %v140_v29, %v139_v31  ;;  %v61_v48 = vsel %vm60_vm6, %v59_v33, %v58_v36 }
  0x19   :  { %210 = vperm.xlu1 %261, %v30_v6   ;;  %v37_v44 = vld [vmem:[#allocation2 + $0x14] sm:$0x1]  ;;  %v62_v45 = vrot.slane %v36_v32, 4  ;;  %v83_v46 = vld [vmem:[#allocation2 + $0x15] sm:$0x1]  ;;  %v105_v47 = vrot.slane %v82_v34, 4  ;;  %v104_v51 = vsel %vm60_vm6, %v103_v35, %v102_v39  ;;  %v207_v34 = vlaneseq }
  0x1a   :  { %vm63_vm7 = vcmask 1044484   ;;  %v160_v49 = vld [vmem:[#allocation2 + $0x13] sm:$0x1]  ;;  %v181_v50 = vrot.slane %v159_v37, 5  ;;  %v122_v52 = vld [vmem:[#allocation2 + $0x16] sm:$0x1]  ;;  %v180_v54 = vsel %vm57_vm5, %v179_v38, %v178_v42  ;;  %v143_v55 = vsel %vm60_vm6, %v142_v41, %v141_v43 }
  0x1b   :  { %v144_v53 = vrot.slane %v121_v40, 4  ;;  %v38_v56 = vld [vmem:[#allocation2 + $0x18] sm:$0x1]  ;;  %v65_v57 = vrot.slane %v37_v44, 3  ;;  %v84_v58 = vld [vmem:[#allocation2 + $0x19] sm:$0x1]  ;;  %v64_v60 = vsel %vm63_vm7, %v62_v45, %v61_v48  ;;  %v106_v63 = vsel %vm63_vm7, %v105_v47, %v104_v51 }
  0x1c   :  { %v107_v59 = vrot.slane %v83_v46, 3  ;;  %vm66_vm8 = vcmask 1045509   ;;  %v161_v61 = vld [vmem:[#allocation2 + $0x17] sm:$0x1]  ;;  %v183_v62 = vrot.slane %v160_v49, 4  ;;  %v146_v1 = vrot.slane %v122_v52, 3 }
  0x1d   :  { %v123_v0 = vld [vmem:[#allocation2 + $0x1a] sm:$0x1]  ;;  %v182_v2 = vsel %vm60_vm6, %v181_v50, %v180_v54  ;;  %v145_v3 = vsel %vm63_vm7, %v144_v53, %v143_v55  ;;  %v39_v4 = vld [vmem:[#allocation2 + $0x1c] sm:$0x1]  ;;  %v68_v5 = vrot.slane %v38_v56, 2  ;;  %v109_v7 = vrot.slane %v84_v58, 2 }
  0x1e   :  { %v85_v6 = vld [vmem:[#allocation2 + $0x1d] sm:$0x1]  ;;  %vm69_vm9 = vcmask 1046534   ;;  %v67_v8 = vsel %vm66_vm8, %v65_v57, %v64_v60  ;;  %v162_v9 = vld [vmem:[#allocation2 + $0x1b] sm:$0x1]  ;;  %v185_v10 = vrot.slane %v161_v61, 3  ;;  %v108_v11 = vsel %vm66_vm8, %v107_v59, %v106_v63 }
  0x1f   :  { %v124_v12 = vld [vmem:[#allocation2 + $0x1e] sm:$0x1]  ;;  %v148_v13 = vrot.slane %v123_v0, 2  ;;  %v184_v14 = vsel %vm63_vm7, %v183_v62, %v182_v2  ;;  %v147_v15 = vsel %vm66_vm8, %v146_v1, %v145_v3  ;;  %v71_v16 = vrot.slane %v39_v4, 1  ;;  %v163_v21 = vld [vmem:[#allocation2 + $0x1f] sm:$0x1] }
  0x20   :  { %v111_v17 = vrot.slane %v85_v6, 1  ;;  %vm72_vm10 = vcmask 1047559   ;;  %v70_v19 = vsel %vm69_vm9, %v68_v5, %v67_v8  ;;  %v187_v22 = vrot.slane %v162_v9, 2  ;;  %s244_s2 = sshll.u32 %s314_s1, 4  ;;  %s245_s2 = int_to_ptr.vmem [resolvable:$true] %s244_s2 }
  0x21   :  { %v110_v23 = vsel %vm69_vm9, %v109_v7, %v108_v11  ;;  %v150_v24 = vrot.slane %v124_v12, 1  ;;  %v186_v25 = vsel %vm66_vm8, %v185_v10, %v184_v14  ;;  %v149_v26 = vsel %vm69_vm9, %v148_v13, %v147_v15  ;;  %s286_s23 = scalar_lea.vmem %s245_s2, 16  ;;  %s290_s24 = scalar_lea.vmem %s245_s2, 32 }
  0x22   :  { %v73_v27 = vsel %vm72_vm10, %v71_v16, %v70_v19  ;;  %v189_v28 = vrot.slane %v163_v21, 1  ;;  %v112_v29 = vsel %vm72_vm10, %v111_v17, %v110_v23  ;;  %v188_v30 = vsel %vm69_vm9, %v187_v22, %v186_v25  ;;  %p287_p5 = scmp.ne.s32.totalorder %s245_s2, %s286_s23  ;;  %p291_p6 = scmp.lt.s32.totalorder %s245_s2, %s245_s2 }
  0x23   :  { %v151_v33 = vsel %vm72_vm10, %v150_v24, %v149_v26  ;;  %v208_v41 = vand.u32 127, %v207_v34  ;;  %vm194_vm15 = vcmask 261120   ;;  %vm225_vm1 = vcmask 7168   ;;  %p292_p7 = scmp.lt.s32.totalorder %s290_s24, %s286_s23 }
  0x24   :  { %v190_v37 = vsel %vm72_vm10, %v189_v28, %v188_v30 }
  0x25   :  { %p293_p8 = por %p292_p7, %p291_p6 }
  0x27   :  { %p294_p9 = pnand %p293_p8, %p287_p5 }
  0x8c   :  { %v128_v18 = vpop.permute.xlu1 %127  ;;  %v43_v20 = vpop.permute.xlu0 %42 }
  0x8d   :  { %vm44_vm11 = vcmp.eq.s32.totalorder %v43_v20, 1  ;;  %vm129_vm12 = vcmp.eq.s32.totalorder %v128_v18, 1 }
  0x8e   :  { %v75_v35 = vsel %vm44_vm11, %v73_v27, 0.0  ;;  %v153_v39 = vsel %vm129_vm12, %v151_v33, 0.0 }
  0x90   :  { %v167_v31 = vpop.permute.xlu1 %166  ;;  %v89_v32 = vpop.permute.xlu0 %88 }
  0x91   :  { %vm90_vm13 = vcmp.eq.s32.totalorder %v89_v32, 1  ;;  %vm168_vm14 = vcmp.eq.s32.totalorder %v167_v31, 1 }
  0x92   :  { %v114_v36 = vsel %vm90_vm13, %v112_v29, 0.0  ;;  %v192_v42 = vsel %vm168_vm14, %v190_v37, 0.0 }
  0x93   :  { %v115_v38 = vadd.f32 %v114_v36, %v75_v35 }
  0x94   :  { %v211_v43 = vpop.permute.xlu1 %210 }
  0x95   :  { %v154_v40 = vadd.f32 %v153_v39, %v115_v38  ;;  %vm212_vm0 = vcmp.eq.s32.totalorder %v208_v41, %v211_v43 }
  0x97   :  { %v193_v44 = vadd.f32 %v192_v42, %v154_v40 }
  0x99   :  { %v195_v45 = vsel %vm194_vm15, %v193_v44, -inf  ;;  %v213_v46 = vsel %vm212_vm0, %v193_v44, 0.0 }
  0x9a   :  { %196 = vmax.xlane.f32.xlu0 %v195_v45  ;;  %v214_v47 = vsel %vm194_vm15, %v213_v46, 0.0 }
  0x9e   :  { %215 = vadd.xlane.f32.xlu0 %v214_v47 }
 0x123   :  { %v197_v48 = vpop.xlane.xlu0 %196 }
 0x124   :  { %v198_v49 = vsub.f32 %v193_v44, %v197_v48 }
 0x126   :  { %v199_v50 = vmul.f32 1.442695, %v198_v49 }
 0x127   :  { %v216_v57 = vpop.xlane.xlu0 %215 }
 0x128   :  { %262 = vpow2.f32 %v199_v50 }
 0x135   :  { %v263_v51 = vpop.eup %262 }
 0x136   :  { %v201_v52 = vsel %vm194_vm15, %v263_v51, 0.0 }
 0x137   :  { %202 = vadd.xlane.f32.xlu1 %v201_v52 }
 0x1c0   :  { %v203_v53 = vpop.xlane.xlu1 %202 }
 0x1c1   :  { %264 = vlog2.f32 %v203_v53 }
 0x1ce   :  { %v265_v54 = vpop.eup %264 }
 0x1cf   :  { %v205_v55 = vmul.f32 0.6931472, %v265_v54 }
 0x1d1   :  { %v206_v56 = vadd.f32 %v205_v55, %v197_v48 }
 0x1d3   :  { %v223_v58 = vsub.f32 %v206_v56, %v216_v57 }
 0x1d5   :  { %v226_v59 = vsel %vm225_vm1, %v223_v58, 0.0 }
 0x1d6   :  { %227 = vadd.xlane.f32.xlu0 %v226_v59 }
 0x25f   :  { %v228_v60 = vpop.xlane.xlu0 %227 }
 0x260   :  { %v229_v61 = vrot.slane %v228_v60, 4 }
 0x262   :  { %v230_v62 = vadd.f32 %v229_v61, %v228_v60 }
 0x264   :  { %v231_v63 = vrot.slane %v230_v62, 2 }
 0x266   :  { %v232_v0 = vadd.f32 %v231_v63, %v230_v62 }
 0x268   :  { %v233_v1 = vrot.slane %v232_v0, 1 }
 0x26a   :  { %v234_v2 = vadd.f32 %v233_v1, %v232_v0 }
 0x26c   :  { %253 = vpush %v234_v2 }
 0x29d   :  { %s254_s22 = spop %253 }
 0x29e   :  { %v236_v3 = vstv %s254_s22 }
 0x29f   :  { %237 = vst [vmem:[#allocation5] sm:$0x1] %v236_v3 }
 0x2a0   :  { %297 = shalt.err (!%p294_p9)
}
 0x2a1   :  { %247 = dma.vmem_to_hbm [thread:$0]  %s245_s2, 16, %s378_s3, [#allocation4]  }
 0x2a2   :  { %308 = dma.done.wait [#allocation4], 16  }
 0x2a3   :  { %309 = vsyncadd [#allocation4], 4294967280 }
 0x2a4   :  { %251 = vsyncpa [#allocation3], 1 }
 0x2a5   :  { %252 = vsyncpa [#allocation4], 1 }

</bundles_post_ra>
